<compile_context>
chip_gen: v7x
topology: tpu7x:2x2x1
jax: 0.10.0
libtpu: 0.0.40
codegen_flags: <defaults>
</compile_context>

<pallas_src>
import jax
import jax.numpy as jnp
from jax.experimental import pallas as pl
from jax.experimental.pallas import tpu as pltpu

_VMEM_BUDGET = 40 * 1024 * 1024   # tile-selection budget (fits v7x's 64 MiB VMEM)
_VMEM_LIMIT = 48 * 1024 * 1024    # scoped VMEM limit handed to Mosaic


def _round_up(x, m):
    return (x + m - 1) // m * m


def _c1_kernel(x_ref, w1_ref, b1_ref, w2_ref, b2_ref, o_ref):
    # x_ref:  (1, Cin, TS)      spatial tile: channels on sublanes, pixels on lanes
    # w1_ref: (Cmid, Cin)       conv1x1 weight with BN folded in (compute dtype)
    # b1_ref: (Cmid, 1)  f32    broadcasts along lanes (spatial)
    # w2_ref: (Cout_pad, Cmid)  conv_last weight (compute dtype)
    # b2_ref: (Cout_pad, 1) f32
    # o_ref:  (1, Cout_pad, TS) f32
    x = x_ref[0]                                                       # (Cin, TS)
    h = jnp.dot(w1_ref[...], x, preferred_element_type=jnp.float32)   # (Cmid, TS) f32 acc
    h = jnp.maximum(h + b1_ref[...], 0.0)                             # bias + ReLU in f32
    h = h.astype(w2_ref.dtype)                                        # back to MXU dtype
    y = jnp.dot(w2_ref[...], h, preferred_element_type=jnp.float32)   # (Cout_pad, TS)
    y = y + b2_ref[...]
    o_ref[0] = y.astype(o_ref.dtype)


def _pick_spatial_tile(hw, n, stream_bytes_per_lane, weight_bytes, vmem_budget):
    """Largest multiple-of-128 spatial tile whose double-buffered in/out tiles
    plus (conservatively double-buffered) weights fit the VMEM budget, capped so
    the grid keeps >= 4 tiles for v7x's two TensorCores when achievable."""
    hw_pad = _round_up(max(hw, 128), 128)
    avail = max(0, vmem_budget - weight_bytes)
    ts = max(128, (avail // max(1, stream_bytes_per_lane)) // 128 * 128)
    ts = min(ts, hw_pad)
    if n * pl.cdiv(hw, 128) >= 4:          # megacore balance is achievable
        while ts > 128 and n * pl.cdiv(hw, ts) < 4:
            ts -= 128
    return ts


def c1_forward(x_nchw, w1, b1, w2, b2, *, compute_dtype=jnp.bfloat16,
               out_dtype=jnp.float32):
    """x_nchw: (N, Cin, H, W).  w1: (Cmid, Cin), b1: (Cmid,), w2: (Cout, Cmid),
    b2: (Cout,).  Returns (N, Cout, H, W) in out_dtype."""
    N, Cin, H, W = x_nchw.shape
    Cmid = w1.shape[0]
    Cout = w2.shape[0]
    HW = H * W
    Cout_pad = _round_up(Cout, 8)          # aligned sublane stores for the output

    # (N, Cin, H, W) -> (N, Cin, H*W): free view, no transpose / no HBM pass.
    x3 = x_nchw.reshape(N, Cin, HW)
    # Stream data in bf16 (halves HBM bytes; f32 accumulation preserved). For max
    # benefit the producer should already emit bf16 so this cast fuses upstream.
    x3 = x3.astype(compute_dtype)
    w1c = w1.astype(compute_dtype)
    w2c = w2.astype(compute_dtype)
    b2v = b2
    if Cout_pad != Cout:                   # pad only the tiny weights, never x
        w2c = jnp.pad(w2c, ((0, Cout_pad - Cout), (0, 0)))
        b2v = jnp.pad(b2v, ((0, Cout_pad - Cout),))
    b1c = b1.astype(jnp.float32).reshape(Cmid, 1)
    b2c = b2v.astype(jnp.float32).reshape(Cout_pad, 1)

    # Lane floor: only pad when the whole image is narrower than one vreg row.
    HW_k = HW
    if HW < 128:
        x3 = jnp.pad(x3, ((0, 0), (0, 0), (0, 128 - HW)))
        HW_k = 128

    in_b = jnp.dtype(compute_dtype).itemsize
    out_b = jnp.dtype(out_dtype).itemsize
    stream_bytes_per_lane = 2 * (Cin * in_b + Cout_pad * out_b)       # double-buffered x/out
    weight_bytes = 2 * ((Cmid * Cin + Cout_pad * Cmid) * in_b + (Cmid + Cout_pad) * 4)
    ts = _pick_spatial_tile(HW_k, N, stream_bytes_per_lane, weight_bytes, _VMEM_BUDGET)

    grid = (N, pl.cdiv(HW_k, ts))          # ragged tail handled by Pallas, no jnp.pad pass
    cost = pl.CostEstimate(
        flops=2 * N * HW * (Cin * Cmid + Cmid * Cout_pad),
        transcendentals=0,
        bytes_accessed=N * HW * (Cin * in_b + Cout_pad * out_b)
        + (Cmid * Cin + Cout_pad * Cmid) * in_b + (Cmid + Cout_pad) * 4,
    )

    def _call(single_buffer_weights):
        # Grid-invariant operands: fetched once; single-buffer them to halve
        # their VMEM footprint (matters at large fc_dim, esp. on v7x).
        wkw = dict(pipeline_mode=pl.Buffered(1)) if single_buffer_weights else {}
        return pl.pallas_call(
            _c1_kernel,
            out_shape=jax.ShapeDtypeStruct((N, Cout_pad, HW_k), out_dtype),
            grid_spec=pltpu.PrefetchScalarGridSpec(
                num_scalar_prefetch=0,
                grid=grid,
                in_specs=[
                    pl.BlockSpec((1, Cin, ts), lambda n, s: (n, 0, s)),        # x tile
                    pl.BlockSpec((Cmid, Cin), lambda n, s: (0, 0), **wkw),     # w1 (resident)
                    pl.BlockSpec((Cmid, 1), lambda n, s: (0, 0), **wkw),       # b1
                    pl.BlockSpec((Cout_pad, Cmid), lambda n, s: (0, 0), **wkw),  # w2 (resident)
                    pl.BlockSpec((Cout_pad, 1), lambda n, s: (0, 0), **wkw),   # b2
                ],
                out_specs=pl.BlockSpec((1, Cout_pad, ts), lambda n, s: (n, 0, s)),
            ),
            compiler_params=pltpu.CompilerParams(
                dimension_semantics=("parallel", "parallel"),
                vmem_limit_bytes=_VMEM_LIMIT,
            ),
            cost_estimate=cost,
        )(x3, w1c, b1c, w2c, b2c)

    try:
        out3 = _call(True)
    except Exception:
        # Fallback if this JAX build rejects pipeline_mode=pl.Buffered(1).
        out3 = _call(False)

    out3 = out3[:, :Cout, :HW]
    return out3.reshape(N, Cout, H, W)     # free reshape back to NCHW


def make_params(key, fc_dim, n_classes, eps=1e-5):
    """Deterministic parameter init; BN (inference mode) folded into conv1.
    Weights kept in torch (Cout, Cin) layout since the kernel computes W @ x."""
    ks = jax.random.split(key, 8)
    w_conv1 = jax.random.normal(ks[0], (fc_dim, fc_dim), jnp.float32) * 0.05
    b_conv1 = jax.random.normal(ks[1], (fc_dim,), jnp.float32) * 0.05
    gamma = 1.0 + 0.1 * jax.random.normal(ks[2], (fc_dim,), jnp.float32)
    beta = 0.1 * jax.random.normal(ks[3], (fc_dim,), jnp.float32)
    run_mean = 0.1 * jax.random.normal(ks[4], (fc_dim,), jnp.float32)
    run_var = 1.0 + 0.1 * jax.random.uniform(ks[5], (fc_dim,), jnp.float32)
    scale = gamma / jnp.sqrt(run_var + eps)
    w1 = w_conv1 * scale[:, None]                            # (Cmid, Cin)
    b1 = (b_conv1 - run_mean) * scale + beta                 # (Cmid,)
    w2 = jax.random.normal(ks[6], (n_classes, fc_dim), jnp.float32) * 0.05  # (Cout, Cmid)
    b2 = jax.random.normal(ks[7], (n_classes,), jnp.float32) * 0.05
    return w1, b1, w2, b2


def c1_reference(x_nchw, w1, b1, w2, b2):
    """Pure-JAX f32 reference of the same (BN-folded) computation."""
    h = jnp.einsum("nchw,mc->nmhw", x_nchw, w1) + b1[None, :, None, None]
    h = jnp.maximum(h, 0.0)
    y = jnp.einsum("nchw,mc->nmhw", h, w2) + b2[None, :, None, None]
    return y


if __name__ == "__main__":
    # small shapes consistent with the module: fc_dim=32, n_classes=8
    N, FC_DIM, H, W = 2, 32, 16, 16
    N_CLASSES = 8

    key = jax.random.PRNGKey(0)
    k_x, k_p = jax.random.split(key)
    conv5 = jax.random.normal(k_x, (N, FC_DIM, H, W), jnp.float32)
    w1, b1, w2, b2 = make_params(k_p, FC_DIM, N_CLASSES)
    ref = c1_reference(conv5, w1, b1, w2, b2)

    # Exact-dtype path (f32 stream) — tight numerical check.
    out_f32 = jax.block_until_ready(
        c1_forward(conv5, w1, b1, w2, b2, compute_dtype=jnp.float32))
    assert out_f32.shape == (N, N_CLASSES, H, W), out_f32.shape
    assert jnp.allclose(out_f32, ref, atol=1e-4, rtol=1e-4), \
        float(jnp.abs(out_f32 - ref).max())

    # Default fast path (bf16 stream/MXU, f32 accumulate) — loose check.
    out = jax.block_until_ready(c1_forward(conv5, w1, b1, w2, b2))
    assert out.shape == (N, N_CLASSES, H, W), out.shape
    assert jnp.allclose(out, ref, atol=3e-2, rtol=3e-2), \
        float(jnp.abs(out - ref).max())

    # TODO(synk): segSize (bilinear upsample) and softmax branches are inactive
    # under the default forward (segSize=None, use_softmax=False) and are not implemented.
    print("KERNEL_OK")
</pallas_src>

<mosaic_0001>
module attributes {stable_mosaic.version = 11 : i64} {
  func.func @_c1_kernel(%arg0: i32, %arg1: i32, %arg2: memref<1x32x128xf32, #tpu.memory_space<vmem>>, %arg3: memref<32x32xf32, #tpu.memory_space<vmem>>, %arg4: memref<32x1xf32, #tpu.memory_space<vmem>>, %arg5: memref<8x32xf32, #tpu.memory_space<vmem>>, %arg6: memref<8x1xf32, #tpu.memory_space<vmem>>, %arg7: memref<1x8x128xf32, #tpu.memory_space<vmem>>) attributes {dimension_semantics = [#tpu.dimension_semantics<parallel>, #tpu.dimension_semantics<parallel>], iteration_bounds = array<i64: 2, 2>, scalar_prefetch = 0 : i64, scratch_operands = 0 : i64, tpu.core_type = #tpu.core_type<tc>, window_params = [{transform_indices = @transform_0, window_bounds = array<i64: 1, 32, 128>}, {pipeline_mode = #tpu.pipeline_mode<synchronous>, transform_indices = @transform_1, window_bounds = array<i64: 32, 32>}, {pipeline_mode = #tpu.pipeline_mode<synchronous>, transform_indices = @transform_2, window_bounds = array<i64: 32, 1>}, {pipeline_mode = #tpu.pipeline_mode<synchronous>, transform_indices = @transform_3, window_bounds = array<i64: 8, 32>}, {pipeline_mode = #tpu.pipeline_mode<synchronous>, transform_indices = @transform_4, window_bounds = array<i64: 8, 1>}, {transform_indices = @transform_5, window_bounds = array<i64: 1, 8, 128>}]} {
    %c0 = arith.constant 0 : index
    %c0_0 = arith.constant 0 : index
    %c0_1 = arith.constant 0 : index
    %0 = vector.load %arg2[%c0, %c0_0, %c0_1] : memref<1x32x128xf32, #tpu.memory_space<vmem>>, vector<1x32x128xf32>
    %1 = vector.shape_cast %0 : vector<1x32x128xf32> to vector<32x128xf32>
    %c0_2 = arith.constant 0 : index
    %c0_3 = arith.constant 0 : index
    %2 = vector.load %arg3[%c0_2, %c0_3] : memref<32x32xf32, #tpu.memory_space<vmem>>, vector<32x32xf32>
    %cst = arith.constant dense<0.000000e+00> : vector<32x128xf32>
    %3 = tpu.matmul %2, %1, %cst {dimension_numbers = #tpu.dot_dimension_numbers<[1], [0], [0], [1], [0, 0, 1, 1], [], []>} : vector<32x32xf32>, vector<32x128xf32>, vector<32x128xf32> -> vector<32x128xf32>
    %c0_4 = arith.constant 0 : index
    %c0_5 = arith.constant 0 : index
    %4 = vector.load %arg4[%c0_4, %c0_5] : memref<32x1xf32, #tpu.memory_space<vmem>>, vector<32x1xf32>
    %5 = vector.broadcast %4 : vector<32x1xf32> to vector<32x128xf32>
    %6 = arith.addf %3, %5 : vector<32x128xf32>
    %cst_6 = arith.constant 0.000000e+00 : f32
    %7 = vector.broadcast %cst_6 : f32 to vector<32x128xf32>
    %8 = arith.maximumf %6, %7 : vector<32x128xf32>
    %c0_7 = arith.constant 0 : index
    %c0_8 = arith.constant 0 : index
    %9 = vector.load %arg5[%c0_7, %c0_8] : memref<8x32xf32, #tpu.memory_space<vmem>>, vector<8x32xf32>
    %cst_9 = arith.constant dense<0.000000e+00> : vector<8x128xf32>
    %10 = tpu.matmul %9, %8, %cst_9 {dimension_numbers = #tpu.dot_dimension_numbers<[1], [0], [0], [1], [0, 0, 1, 1], [], []>} : vector<8x32xf32>, vector<32x128xf32>, vector<8x128xf32> -> vector<8x128xf32>
    %c0_10 = arith.constant 0 : index
    %c0_11 = arith.constant 0 : index
    %11 = vector.load %arg6[%c0_10, %c0_11] : memref<8x1xf32, #tpu.memory_space<vmem>>, vector<8x1xf32>
    %12 = vector.broadcast %11 : vector<8x1xf32> to vector<8x128xf32>
    %13 = arith.addf %10, %12 : vector<8x128xf32>
    %c0_12 = arith.constant 0 : index
    %c0_13 = arith.constant 0 : index
    %c0_14 = arith.constant 0 : index
    %14 = vector.load %arg7[%c0_12, %c0_13, %c0_14] : memref<1x8x128xf32, #tpu.memory_space<vmem>>, vector<1x8x128xf32>
    %15 = vector.shape_cast %14 : vector<1x8x128xf32> to vector<8x128xf32>
    %16 = vector.shape_cast %13 : vector<8x128xf32> to vector<1x8x128xf32>
    tpu.vector_store %arg7[%c0_12, %c0_13, %c0_14], %16 {strides = array<i32>} : memref<1x8x128xf32, #tpu.memory_space<vmem>>, vector<1x8x128xf32>,
    return
  }
  func.func @transform_0(%arg0: i32, %arg1: i32) -> (i32, i32, i32) {
    %c0_i32 = arith.constant 0 : i32
    %c0_i32_0 = arith.constant 0 : i32
    return %arg0, %c0_i32, %arg1 : i32, i32, i32
  }
  func.func @transform_1(%arg0: i32, %arg1: i32) -> (i32, i32) {
    %c0_i32 = arith.constant 0 : i32
    %c0_i32_0 = arith.constant 0 : i32
    %c0_i32_1 = arith.constant 0 : i32
    return %c0_i32, %c0_i32_0 : i32, i32
  }
  func.func @transform_2(%arg0: i32, %arg1: i32) -> (i32, i32) {
    %c0_i32 = arith.constant 0 : i32
    %c0_i32_0 = arith.constant 0 : i32
    %c0_i32_1 = arith.constant 0 : i32
    return %c0_i32, %c0_i32_0 : i32, i32
  }
  func.func @transform_3(%arg0: i32, %arg1: i32) -> (i32, i32) {
    %c0_i32 = arith.constant 0 : i32
    %c0_i32_0 = arith.constant 0 : i32
    %c0_i32_1 = arith.constant 0 : i32
    return %c0_i32, %c0_i32_0 : i32, i32
  }
  func.func @transform_4(%arg0: i32, %arg1: i32) -> (i32, i32) {
    %c0_i32 = arith.constant 0 : i32
    %c0_i32_0 = arith.constant 0 : i32
    %c0_i32_1 = arith.constant 0 : i32
    return %c0_i32, %c0_i32_0 : i32, i32
  }
  func.func @transform_5(%arg0: i32, %arg1: i32) -> (i32, i32, i32) {
    %c0_i32 = arith.constant 0 : i32
    %c0_i32_0 = arith.constant 0 : i32
    return %arg0, %c0_i32, %arg1 : i32, i32, i32
  }
}

module attributes {stable_mosaic.version = 11 : i64} {
  func.func @_c1_kernel(%arg0: i32, %arg1: i32, %arg2: memref<1x32x128xf32, #tpu.memory_space<vmem>>, %arg3: memref<32x32xf32, #tpu.memory_space<vmem>>, %arg4: memref<32x1xf32, #tpu.memory_space<vmem>>, %arg5: memref<8x32xf32, #tpu.memory_space<vmem>>, %arg6: memref<8x1xf32, #tpu.memory_space<vmem>>, %arg7: memref<1x8x128xf32, #tpu.memory_space<vmem>>) attributes {dimension_semantics = [#tpu.dimension_semantics<parallel>, #tpu.dimension_semantics<parallel>], iteration_bounds = array<i64: 2, 2>, scalar_prefetch = 0 : i64, scratch_operands = 0 : i64, tpu.core_type = #tpu.core_type<tc>, window_params = [{transform_indices = @transform_0, window_bounds = array<i64: 1, 32, 128>}, {pipeline_mode = #tpu.pipeline_mode<synchronous>, transform_indices = @transform_1, window_bounds = array<i64: 32, 32>}, {pipeline_mode = #tpu.pipeline_mode<synchronous>, transform_indices = @transform_2, window_bounds = array<i64: 32, 1>}, {pipeline_mode = #tpu.pipeline_mode<synchronous>, transform_indices = @transform_3, window_bounds = array<i64: 8, 32>}, {pipeline_mode = #tpu.pipeline_mode<synchronous>, transform_indices = @transform_4, window_bounds = array<i64: 8, 1>}, {transform_indices = @transform_5, window_bounds = array<i64: 1, 8, 128>}]} {
    %c0 = arith.constant 0 : index
    %c0_0 = arith.constant 0 : index
    %c0_1 = arith.constant 0 : index
    %0 = vector.load %arg2[%c0, %c0_0, %c0_1] : memref<1x32x128xf32, #tpu.memory_space<vmem>>, vector<1x32x128xf32>
    %1 = vector.shape_cast %0 : vector<1x32x128xf32> to vector<32x128xf32>
    %c0_2 = arith.constant 0 : index
    %c0_3 = arith.constant 0 : index
    %2 = vector.load %arg3[%c0_2, %c0_3] : memref<32x32xf32, #tpu.memory_space<vmem>>, vector<32x32xf32>
    %cst = arith.constant dense<0.000000e+00> : vector<32x128xf32>
    %3 = tpu.matmul %2, %1, %cst {dimension_numbers = #tpu.dot_dimension_numbers<[1], [0], [0], [1], [0, 0, 1, 1], [], []>} : vector<32x32xf32>, vector<32x128xf32>, vector<32x128xf32> -> vector<32x128xf32>
    %c0_4 = arith.constant 0 : index
    %c0_5 = arith.constant 0 : index
    %4 = vector.load %arg4[%c0_4, %c0_5] : memref<32x1xf32, #tpu.memory_space<vmem>>, vector<32x1xf32>
    %5 = vector.broadcast %4 : vector<32x1xf32> to vector<32x128xf32>
    %6 = arith.addf %3, %5 : vector<32x128xf32>
    %cst_6 = arith.constant 0.000000e+00 : f32
    %7 = vector.broadcast %cst_6 : f32 to vector<32x128xf32>
    %8 = arith.maximumf %6, %7 : vector<32x128xf32>
    %c0_7 = arith.constant 0 : index
    %c0_8 = arith.constant 0 : index
    %9 = vector.load %arg5[%c0_7, %c0_8] : memref<8x32xf32, #tpu.memory_space<vmem>>, vector<8x32xf32>
    %cst_9 = arith.constant dense<0.000000e+00> : vector<8x128xf32>
    %10 = tpu.matmul %9, %8, %cst_9 {dimension_numbers = #tpu.dot_dimension_numbers<[1], [0], [0], [1], [0, 0, 1, 1], [], []>} : vector<8x32xf32>, vector<32x128xf32>, vector<8x128xf32> -> vector<8x128xf32>
    %c0_10 = arith.constant 0 : index
    %c0_11 = arith.constant 0 : index
    %11 = vector.load %arg6[%c0_10, %c0_11] : memref<8x1xf32, #tpu.memory_space<vmem>>, vector<8x1xf32>
    %12 = vector.broadcast %11 : vector<8x1xf32> to vector<8x128xf32>
    %13 = arith.addf %10, %12 : vector<8x128xf32>
    %c0_12 = arith.constant 0 : index
    %c0_13 = arith.constant 0 : index
    %c0_14 = arith.constant 0 : index
    %14 = vector.load %arg7[%c0_12, %c0_13, %c0_14] : memref<1x8x128xf32, #tpu.memory_space<vmem>>, vector<1x8x128xf32>
    %15 = vector.shape_cast %14 : vector<1x8x128xf32> to vector<8x128xf32>
    %16 = vector.shape_cast %13 : vector<8x128xf32> to vector<1x8x128xf32>
    tpu.vector_store %arg7[%c0_12, %c0_13, %c0_14], %16 {strides = array<i32>} : memref<1x8x128xf32, #tpu.memory_space<vmem>>, vector<1x8x128xf32>,
    return
  }
  func.func @transform_0(%arg0: i32, %arg1: i32) -> (i32, i32, i32) {
    %c0_i32 = arith.constant 0 : i32
    %c0_i32_0 = arith.constant 0 : i32
    return %arg0, %c0_i32, %arg1 : i32, i32, i32
  }
  func.func @transform_1(%arg0: i32, %arg1: i32) -> (i32, i32) {
    %c0_i32 = arith.constant 0 : i32
    %c0_i32_0 = arith.constant 0 : i32
    %c0_i32_1 = arith.constant 0 : i32
    return %c0_i32, %c0_i32_0 : i32, i32
  }
  func.func @transform_2(%arg0: i32, %arg1: i32) -> (i32, i32) {
    %c0_i32 = arith.constant 0 : i32
    %c0_i32_0 = arith.constant 0 : i32
    %c0_i32_1 = arith.constant 0 : i32
    return %c0_i32, %c0_i32_0 : i32, i32
  }
  func.func @transform_3(%arg0: i32, %arg1: i32) -> (i32, i32) {
    %c0_i32 = arith.constant 0 : i32
    %c0_i32_0 = arith.constant 0 : i32
    %c0_i32_1 = arith.constant 0 : i32
    return %c0_i32, %c0_i32_0 : i32, i32
  }
  func.func @transform_4(%arg0: i32, %arg1: i32) -> (i32, i32) {
    %c0_i32 = arith.constant 0 : i32
    %c0_i32_0 = arith.constant 0 : i32
    %c0_i32_1 = arith.constant 0 : i32
    return %c0_i32, %c0_i32_0 : i32, i32
  }
  func.func @transform_5(%arg0: i32, %arg1: i32) -> (i32, i32, i32) {
    %c0_i32 = arith.constant 0 : i32
    %c0_i32_0 = arith.constant 0 : i32
    return %arg0, %c0_i32, %arg1 : i32, i32, i32
  }
}

</mosaic_0001>

<bundles_post_ra>
// kernel: tpu_custom_call.1
= control target key start
LH: loop header
LB: loop body
LE: loop exit
PB: predicated region body
PF: predicated region fallthrough
CT: control target
= control target key end

     0   :  { %10 = vsyncpa [#allocation3], 0  ;;  %s1133_s0 = inlined_call_operand.hbm [shape: f32[2,32,256], index: 0, kind: input, shape index: {}]   ;;  %s1134_s1 = inlined_call_operand.vmem [shape: f32[32,32], index: 1, kind: input, shape index: {}]   ;;  %s1135_s2 = inlined_call_operand.vmem [shape: f32[32,1], index: 2, kind: input, shape index: {}]   ;;  %s1136_s3 = inlined_call_operand.vmem [shape: f32[8,32], index: 3, kind: input, shape index: {}]   ;;  %s1137_s4 = inlined_call_operand.vmem [shape: f32[8,1], index: 4, kind: input, shape index: {}]   ;;  %s1138_s5 = inlined_call_operand.hbm [shape: f32[2,8,256], index: 5, kind: output, shape index: {}]  }
   0x1   :  { %12 = vsyncpa [#allocation3 + $0x1], 0 }
   0x2   :  { %13 = vsyncpa [#allocation4], 0 }
   0x3   :  { %15 = vsyncpa [#allocation4 + $0x1], 0  ;;  %s904_s18 = smov 0   ;;  %s906_s19 = smov 0  }
   0x4   :  { %s908_s20 = smov 0   ;;  %s910_s21 = smov 0  }
   0x5   :  { %s912_s22 = smov 0   ;;  %s914_s23 = smov 0  }
   0x6   :  { %s916_s24 = smov 0   ;;  %s918_s25 = smov 0  }
   0x7 LB: > { %1143 = sst [smem:[#allocation8_spill]] %s835_s18  ;;  %s576_s26 = sadd.s32 4294967295, %s863_s25   ;;  %s863_s25 = sphi %s918_s25, %s21_s25   ;;  %s859_s24 = sphi %s916_s24, %s1162_s24   ;;  %s855_s23 = sphi %s914_s23, %s1161_s23   ;;  %s851_s22 = sphi %s912_s22, %s1160_s22   ;;  %s847_s21 = sphi %s910_s21, %s1159_s21   ;;  %s843_s20 = sphi %s908_s20, %s1158_s20   ;;  %s839_s19 = sphi %s906_s19, %s1157_s19   ;;  %s835_s18 = sphi %s904_s18, %s1156_s18  }
   0x8   : > { %s577_s27 = sadd.s32 4294967294, %s863_s25   ;;  %s30_s28 = sadd.s32 1, %s855_s23 }
   0x9   : > { %s33_s29 = sadd.s32 1, %s859_s24  ;;  %p31_p0 = scmp.ge.s32.totalorder %s30_s28, 2 }
   0xa   : > { %s42_s30 = sadd.s32 1, %s843_s20  ;;  %p49_p1 = scmp.ne.s32.totalorder %s843_s20, %s839_s19 }
   0xb   : > { %p50_p2 = scmp.eq.s32.totalorder %s863_s25, 0  ;;  %s1164_s28 = smov (%p31_p0, %s30_s28), 0 }
   0xc   : > { %1144 = sst [smem:[#allocation9_spill]] %s1164_s28  ;;  %s1166_s29 = smov (!%p31_p0, %s33_s29), %s859_s24 }
   0xd   : > { %s38_s6 = ssub.s32 %s855_s23, %s1164_s28  ;;  %p957_p3 = por %p50_p2, %p49_p1 }
   0xe   : > { %p35_p4 = scmp.ge.s32.totalorder %s1166_s29, 2  ;;  %p55_p5 = scmp.ne.s32.totalorder %s839_s19, %s835_s18 }
   0xf   : > { %p56_p6 = scmp.eq.s32.totalorder %s576_s26, 0  ;;  %p165_p7 = scmp.eq.s32.totalorder %s576_s26, 3 }
  0x10   : > { %s1168_s29 = smov (%p35_p4, %s1166_s29), 0  ;;  %p171_p10 = scmp.eq.s32.totalorder %s577_s27, 3 }
  0x11   : > { %1146 = sst [smem:[#allocation10_spill]] %s1168_s29  ;;  %p965_p8 = por %p56_p6, %p55_p5 }
  0x12   : > { %p969_p9 = por %p165_p7, %p49_p1  ;;  %s37_s10 = ssub.s32 %s859_s24, %s1168_s29 }
  0x13   : > { %s39_s11 = sor.u32 %s38_s6, %s37_s10  ;;  %p975_p12 = por %p171_p10, %p55_p5 }
  0x14   : > { %s1148_s9 = scalar_select %p969_p9, 1, 0 }
  0x15   : > { %p40_p11 = scmp.eq.s32.totalorder %s39_s11, 0  ;;  %p660_p13 = scmp.lt.s32.totalorder %s863_s25, 4 }
  0x16   : > { %s1149_s12 = scalar_select %p975_p12, 1, 0 }
  0x17   : > { %s203_s13 = sand.u32 1, %s843_s20   ;;  %s581_s16 = sshll.u32 %s859_s24, 3 }
  0x18   : > { %s982_s14 = scalar_select %p40_p11, %s843_s20, %s42_s30  }
  0x19   : > { %s580_s15 = sshll.u32 %s203_s13, 5  ;;  %s212_s17 = sadd.s32 %s855_s23, %s581_s16 }
  0x1a   : > { %s207_s26 = scalar_lea.vmem [#allocation2], %s580_s15  ;;  %s582_s18 = sshll.u32 %s212_s17, 7 }
  0x1b   : > { %s215_s28 = sshll.u32 %s207_s26, 4  ;;  %s991_s6 = scalar_lea.hbm %s1133_s0, %s582_s18  ;;  %s986_s28 = int_to_ptr.vmem [resolvable:$true] %s215_s28 }
  0x1c   : > { %p995_p0 = pnand %p660_p13, %p957_p3  ;;  %s999_s10 = scalar_lea.sflag [#allocation3], %s203_s13 }
  0x1d   : > { %s735_s11 = scalar_lea.hbm %s991_s6, 512  ;;  %s740_s7 = scalar_lea.hbm %s1133_s0, 2048 }
  0x1e   : > { %p736_p1 = scmp.ne.s32.totalorder %s991_s6, %s735_s11  ;;  %p737_p2 = pneg %p995_p0 }
  0x1f   : > { %p741_p3 = scmp.lt.u32.totalorder %s991_s6, %s1133_s0  ;;  %p742_p6 = scmp.lt.u32.totalorder %s740_s7, %s735_s11 }
  0x20   : > { %p738_p4 = pnand %p737_p2, %p736_p1  ;;  %p744_p10 = scmp.lt.u32.totalorder %s735_s11, %s991_s6 }
  0x21   : > { %p743_p7 = por %p742_p6, %p741_p3 }
  0x22   : > { %p739_p5 = pneg %p738_p4 }
  0x23   : > { %p745_p11 = por %p744_p10, %p743_p7 }
  0x25   : > { %p746_p13 = pnand %p745_p11, %p739_p5 }
  0x27   : > { %749 = shalt.err (!%p746_p13)
}
  0x28   : > { %s750_s13 = scalar_lea.vmem %s986_s28, 512  ;;  %s865_s17 = smov [#allocation2]  }
  0x29   : > { %p751_p1 = scmp.ne.s32.totalorder %s986_s28, %s750_s13  ;;  %s755_s26 = sshll.u32 %s865_s17, 4  ;;  %s756_s26 = int_to_ptr.vmem [resolvable:$false] %s755_s26 }
  0x2a   : > { %s757_s27 = scalar_lea.vmem %s756_s26, 1024  ;;  %p758_p9 = scmp.lt.s32.totalorder %s986_s28, %s756_s26 }
  0x2b   : > { %p753_p4 = pnand %p751_p1, %p737_p2  ;;  %p759_p3 = scmp.lt.s32.totalorder %s757_s27, %s750_s13 }
  0x2d   : > { %p754_p12 = pneg %p753_p4  ;;  %p760_p6 = por %p759_p3, %p758_p9 }
  0x2f   : > { %p761_p7 = pnand %p760_p6, %p754_p12 }
  0x31   : > { %764 = shalt.err (!%p761_p7)
}
  0x32   : > { %s866_s11 = smov 256   ;;  %s867_s18 = smov 128  }
  0x33   : > { %s868_s29 = smov 8   ;;  %p583_p2 = scmp.ge.s32.totalorder %s863_s25, 1 }
  0x34   : > { %655 = dma.hbm_to_vmem [thread:$0]  (!%p995_p0), %s991_s6, 512, %s986_s28, %s999_s10, %s866_s11, %s867_s18, %s868_s29  }
  0x35   : > { %p223_p5 = scmp.lt.s32.totalorder %s863_s25, 5 }
  0x37   : > { %p224_p10 = pnand %p583_p2, %p223_p5 }
  0x38   : > { %s1030_s7 = sand.u32 (!%p224_p10), 1, %s839_s19  }
  0x39   : > { %227 = sbr.rel (%p224_p10) target bundleno = 530 (0x212), region = 40  ;;  %s584_s15 = sshll.u32 (!%p224_p10), %s1030_s7, 5 }
  0x3a   : > { %s230_s16 = scalar_lea.sflag (!%p224_p10), [#allocation3], %s1030_s7  ;;  %s233_s13 = scalar_lea.vmem (!%p224_p10), [#allocation2], %s584_s15 }
  0x40   : > { %826 = dma.done.wait (%p965_p8), %s230_s16, 512  }
  0x41   : > { %828 = vsyncadd (%p965_p8), %s230_s16, 4294966784  ;;  %v869_v0 = vmov 0   ;;  %vm292_vm0 = vcmask 261120   ;;  %v260_v1 = vld [vmem:[%s233_s13] sm:$0xff]  ;;  %v261_v2 = vld [vmem:[%s233_s13 + $0x8] sm:$0xff]  ;;  %v870_v16 = vmov 0.0|0.0  }
  0x42   : > { %733 = vset.pattern.permute.xlu0 %v869_v0  ;;  %734 = vset.pattern.permute.xlu1 %v869_v0  ;;  %v262_v3 = vld [vmem:[%s233_s13 + $0x10] sm:$0xff]  ;;  %v634_v4 = vpack.c.bf16 %v261_v2, %v260_v1  ;;  %v263_v5 = vld [vmem:[%s233_s13 + $0x18] sm:$0xff]  ;;  %v264_v6 = vld [vmem:[%s1134_s1] sm:$0xff]  ;;  %vm871_vm1 = vmmov 0   ;;  %v872_v17 = vmov 0.0   ;;  %s585_s26 = sshll.u32 %s1030_s7, 3 }
  0x43   : > { %v638_v7 = vpack.c.bf16 %v263_v5, %v262_v3  ;;  %617 = vmatprep.mubr.msk.f32.mxu0 %vm292_vm0, %v264_v6  ;;  %v268_v8 = vld [vmem:[%s1135_s2] sm:$0xff]  ;;  %v270_v9 = vld [vmem:[%s1135_s2 + $0x10] sm:$0xff]  ;;  %v269_v10 = vld [vmem:[%s1135_s2 + $0x8] sm:$0xff]  ;;  %642 = vmatprep.subr.bf16.mxu1 %v870_v16  ;;  %s592_s27 = sshll.u32 %s851_s22, 1  ;;  %s259_s29 = scalar_lea.vmem [#allocation5], %s585_s26 }
  0x44   : > { %635 = vmatprep.subr.bf16.mxu0 %v634_v4  ;;  %274 = vperm.xlu0 %733, %v268_v8   ;;  %v271_v11 = vld [vmem:[%s1135_s2 + $0x18] sm:$0xff]  ;;  %v265_v12 = vld [vmem:[%s1134_s1 + $0x8] sm:$0xff]  ;;  %v395_v13 = vld [vmem:[%s1137_s4] sm:$0xff]  ;;  %s487_s11 = sadd.s32 %s847_s21, %s592_s27  ;;  %s491_s15 = sshll.u32 %s259_s29, 4  ;;  %s1081_s15 = int_to_ptr.vmem [resolvable:$true] %s491_s15 }
  0x45   : > { %637 = vmatpush3.bf16.msra.mxu0 %v634_v4  ;;  %284 = vperm.xlu1 %734, %v270_v9   ;;  %v266_v14 = vld [vmem:[%s1134_s1 + $0x10] sm:$0xff]  ;;  %v267_v15 = vld [vmem:[%s1134_s1 + $0x18] sm:$0xff]  ;;  %v394_v36 = vld [vmem:[%s1136_s3] sm:$0xff]  ;;  %s593_s18 = sshll.u32 %s487_s11, 7  ;;  %s476_s22 = scalar_lea.sflag [#allocation4], %s1030_s7 }
  0x46   : > { %639 = vmatprep.subr.bf16.mxu0 %v638_v7  ;;  %631 = vmatprep.mubr.msk.f32.mxu1 %vm871_vm1, %v872_v17  ;;  %s1079_s28 = scalar_lea.hbm %s1138_s5, %s593_s18  ;;  %s765_s21 = scalar_lea.vmem %s1081_s15, 128 }
  0x47   : > { %p766_p8 = scmp.ne.s32.totalorder %s1081_s15, %s765_s21  ;;  %p1151_p9 = scmp.ne.s32.totalorder %s1148_s9, 0 }
  0x48   : > { %279 = vperm.xlu0 %733, %v269_v10   ;;  %s873_s6 = smov [#allocation5]  }
  0x49   : > { %641 = vmatpush3.bf16.msra.mxu0 %v638_v7  ;;  %289 = vperm.xlu1 %734, %v271_v11   ;;  %p767_p12 = pnand %p766_p8, %p1151_p9  ;;  %s769_s30 = sshll.u32 %s873_s6, 4  ;;  %s770_s30 = int_to_ptr.vmem [resolvable:$false] %s769_s30 }
  0x4a   : > { %s771_s10 = scalar_lea.vmem %s770_s30, 256  ;;  %p772_p11 = scmp.lt.s32.totalorder %s1081_s15, %s770_s30 }
  0x4b   : > { %p768_p0 = pneg %p767_p12  ;;  %p773_p13 = scmp.lt.s32.totalorder %s771_s10, %s765_s21 }
  0x4c   : > { %618 = vmatmul.mubr.msk.f32.vlgmr.msra.gmra.mrb[0].mxu0 %vm292_vm0, %v265_v12  ;;  %398 = vperm.xlu0 %733, %v395_v13  }
  0x4d   : > { %620 = vmatprep.mubr.msk.f32.mxu0 %vm292_vm0, %v266_v14  ;;  %p774_p1 = por %p773_p13, %p772_p11 }
  0x4f   : > { %p775_p4 = pnand %p774_p1, %p768_p0 }
  0x50   : > { %621 = vmatmul.mubr.msk.f32.gmra.mrb[2].mxu0 %vm292_vm0, %v267_v15 }
  0xc3   : > { %v275_v18 = vpop.permute.xlu0 %274 }
  0xc4   : > { %v285_v19 = vpop.permute.xlu1 %284 }
  0xc7   : > { %v280_v20 = vpop.permute.xlu0 %279 }
  0xc8   : > { %v290_v26 = vpop.permute.xlu1 %289 }
  0xcb   : > { %v399_v37 = vpop.permute.xlu0 %398 }
 0x11f   : > { %v619_v21 = vpop.f32.mrb[0].mxu0 }
 0x120   : > { %v377_v22 = vadd.f32 %v619_v21, %v280_v20  ;;  %v371_v23 = vpop.f32.mrb[1].mxu0 }
 0x121   : > { %v372_v24 = vadd.f32 %v371_v23, %v275_v18 }
 0x122   : > { %v391_v25 = vmax.f32 %v377_v22, 0.0 }
 0x123   : > { %v390_v27 = vmax.f32 %v372_v24, 0.0  ;;  %v622_v28 = vpop.f32.mrb[2].mxu0 }
 0x124   : > { %v387_v29 = vadd.f32 %v622_v28, %v290_v26  ;;  %v381_v30 = vpop.f32.mrb[3].mxu0 }
 0x125   : > { %v382_v31 = vadd.f32 %v381_v30, %v285_v19  ;;  %v643_v32 = vpack.c.bf16 %v391_v25, %v390_v27 }
 0x126   : > { %v393_v33 = vmax.f32 %v387_v29, 0.0 }
 0x127   : > { %v392_v34 = vmax.f32 %v382_v31, 0.0  ;;  %644 = vmatpush3.bf16.msra.mxu1 %v643_v32 }
 0x128   : > { %645 = vmatprep.subr.bf16.mxu1 %v870_v16 }
 0x129   : > { %v646_v35 = vpack.c.bf16 %v393_v33, %v392_v34 }
 0x12b   : > { %647 = vmatpush3.bf16.msra.mxu1 %v646_v35 }
 0x12e   : > { %632 = vmatmul.mubr.msk.f32.vlgmr.msra.gmra.mrb[0].mxu1 %vm292_vm0, %v394_v36 }
 0x201   : > { %v470_v38 = vpop.f32.mrb[0].mxu1 }
 0x202   : > { %v471_v39 = vadd.f32 %v470_v38, %v399_v37  ;;  %v633_v40 = vpop.f32.mrb[1].mxu1 }
 0x204   : > { %474 = vst [vmem:[%s259_s29] sm:$0xff] %v471_v39 }
 0x205   : > { %778 = shalt.err (!%p775_p4)
}
 0x206   : > { %s779_s7 = scalar_lea.hbm %s1079_s28, 128  ;;  %s783_s26 = scalar_lea.hbm %s1138_s5, 512 }
 0x207   : > { %p780_p3 = scmp.ne.s32.totalorder %s1079_s28, %s779_s7  ;;  %p784_p2 = scmp.lt.u32.totalorder %s1079_s28, %s1138_s5 }
 0x208   : > { %p785_p5 = scmp.lt.u32.totalorder %s783_s26, %s779_s7  ;;  %p787_p8 = scmp.lt.u32.totalorder %s779_s7, %s1079_s28 }
 0x209   : > { %p781_p6 = pnand %p780_p3, %p1151_p9 }
 0x20a   : > { %p786_p10 = por %p785_p5, %p784_p2 }
 0x20b   : > { %p782_p7 = pneg %p781_p6 }
 0x20c   : > { %p788_p12 = por %p787_p8, %p786_p10 }
 0x20e   : > { %p789_p0 = pnand %p788_p12, %p782_p7 }
 0x210   : > { %792 = shalt.err (!%p789_p0)
}
 0x211   : > { %650 = dma.vmem_to_hbm [thread:$0]  (%p1151_p9), %s1081_s15, 128, %s1079_s28, %s476_s22  }
 0x212 PF: > { %s1152_s18 = sld [smem:[#allocation8_spill]]  ;;  %p661_p11 = scmp.ge.s32.totalorder %s863_s25, 2 }
 0x213   : > { %p1153_p13 = scmp.ne.s32.totalorder %s1149_s12, 0 }
 0x215   : > { %p657_p1 = pnand %p661_p11, %p1153_p13 }
 0x218   : > { %s503_s29 = sand.u32 1, %s1152_s18  }
 0x219   : > { %s504_s16 = scalar_lea.sflag [#allocation4], %s503_s29 }
 0x21a   : > { %830 = dma.done.wait (!%p657_p1), %s504_s16, 128  }
 0x21b   : > { %832 = vsyncadd (!%p657_p1), %s504_s16, 4294967168  ;;  %s21_s25 = sadd.s32 1, %s863_s25   ;;  %s1154_s9 = sld [smem:[#allocation9_spill]] }
 0x21c   : > { %p18_p4 = scmp.ge.s32.totalorder %s21_s25, 6   ;;  %s1155_s15 = sld [smem:[#allocation10_spill]] }
 0x21d   : > { %s1156_s18 = smov %s839_s19  ;;  %s1157_s19 = smov %s843_s20 }
 0x21e   : > { %s1158_s20 = smov %s982_s14  ;;  %s1159_s21 = smov %s855_s23 }
 0x21f   : > { %s1160_s22 = smov %s859_s24  ;;  %20 = sbr.rel (!%p18_p4) target bundleno = 7 (0x7), region = 85 }
 0x221   : > { %s1161_s23 = smov %s1154_s9 }
 0x222   : > { %s1162_s24 = smov %s1155_s15 }
 0x226   :  { %509 = vsyncpa [#allocation3], 1 }
 0x227   :  { %511 = vsyncpa [#allocation3 + $0x1], 1 }
 0x228   :  { %512 = vsyncpa [#allocation4], 1 }
 0x229   :  { %514 = vsyncpa [#allocation4 + $0x1], 1 }

// kernel: tpu_custom_call.1
= control target key start
LH: loop header
LB: loop body
LE: loop exit
PB: predicated region body
PF: predicated region fallthrough
CT: control target
= control target key end

     0   :  { %10 = vsyncpa [#allocation3], 0  ;;  %s1133_s0 = inlined_call_operand.hbm [shape: f32[2,32,256], index: 0, kind: input, shape index: {}]   ;;  %s1134_s1 = inlined_call_operand.vmem [shape: f32[32,32], index: 1, kind: input, shape index: {}]   ;;  %s1135_s2 = inlined_call_operand.vmem [shape: f32[32,1], index: 2, kind: input, shape index: {}]   ;;  %s1136_s3 = inlined_call_operand.vmem [shape: f32[8,32], index: 3, kind: input, shape index: {}]   ;;  %s1137_s4 = inlined_call_operand.vmem [shape: f32[8,1], index: 4, kind: input, shape index: {}]   ;;  %s1138_s5 = inlined_call_operand.hbm [shape: f32[2,8,256], index: 5, kind: output, shape index: {}]  }
   0x1   :  { %12 = vsyncpa [#allocation3 + $0x1], 0 }
   0x2   :  { %13 = vsyncpa [#allocation4], 0 }
   0x3   :  { %15 = vsyncpa [#allocation4 + $0x1], 0  ;;  %s904_s18 = smov 0   ;;  %s906_s19 = smov 0  }
   0x4   :  { %s908_s20 = smov 0   ;;  %s910_s21 = smov 0  }
   0x5   :  { %s912_s22 = smov 0   ;;  %s914_s23 = smov 0  }
   0x6   :  { %s916_s24 = smov 0   ;;  %s918_s25 = smov 0  }
   0x7 LB: > { %1143 = sst [smem:[#allocation8_spill]] %s835_s18  ;;  %s576_s26 = sadd.s32 4294967295, %s863_s25   ;;  %s863_s25 = sphi %s918_s25, %s21_s25   ;;  %s859_s24 = sphi %s916_s24, %s1162_s24   ;;  %s855_s23 = sphi %s914_s23, %s1161_s23   ;;  %s851_s22 = sphi %s912_s22, %s1160_s22   ;;  %s847_s21 = sphi %s910_s21, %s1159_s21   ;;  %s843_s20 = sphi %s908_s20, %s1158_s20   ;;  %s839_s19 = sphi %s906_s19, %s1157_s19   ;;  %s835_s18 = sphi %s904_s18, %s1156_s18  }
   0x8   : > { %s577_s27 = sadd.s32 4294967294, %s863_s25   ;;  %s30_s28 = sadd.s32 1, %s855_s23 }
   0x9   : > { %s33_s29 = sadd.s32 1, %s859_s24  ;;  %p31_p0 = scmp.ge.s32.totalorder %s30_s28, 2 }
   0xa   : > { %s42_s30 = sadd.s32 1, %s843_s20  ;;  %p49_p1 = scmp.ne.s32.totalorder %s843_s20, %s839_s19 }
   0xb   : > { %p50_p2 = scmp.eq.s32.totalorder %s863_s25, 0  ;;  %s1164_s28 = smov (%p31_p0, %s30_s28), 0 }
   0xc   : > { %1144 = sst [smem:[#allocation9_spill]] %s1164_s28  ;;  %s1166_s29 = smov (!%p31_p0, %s33_s29), %s859_s24 }
   0xd   : > { %s38_s6 = ssub.s32 %s855_s23, %s1164_s28  ;;  %p957_p3 = por %p50_p2, %p49_p1 }
   0xe   : > { %p35_p4 = scmp.ge.s32.totalorder %s1166_s29, 2  ;;  %p55_p5 = scmp.ne.s32.totalorder %s839_s19, %s835_s18 }
   0xf   : > { %p56_p6 = scmp.eq.s32.totalorder %s576_s26, 0  ;;  %p165_p7 = scmp.eq.s32.totalorder %s576_s26, 3 }
  0x10   : > { %s1168_s29 = smov (%p35_p4, %s1166_s29), 0  ;;  %p171_p10 = scmp.eq.s32.totalorder %s577_s27, 3 }
  0x11   : > { %1146 = sst [smem:[#allocation10_spill]] %s1168_s29  ;;  %p965_p8 = por %p56_p6, %p55_p5 }
  0x12   : > { %p969_p9 = por %p165_p7, %p49_p1  ;;  %s37_s10 = ssub.s32 %s859_s24, %s1168_s29 }
  0x13   : > { %s39_s11 = sor.u32 %s38_s6, %s37_s10  ;;  %p975_p12 = por %p171_p10, %p55_p5 }
  0x14   : > { %s1148_s9 = scalar_select %p969_p9, 1, 0 }
  0x15   : > { %p40_p11 = scmp.eq.s32.totalorder %s39_s11, 0  ;;  %p660_p13 = scmp.lt.s32.totalorder %s863_s25, 4 }
  0x16   : > { %s1149_s12 = scalar_select %p975_p12, 1, 0 }
  0x17   : > { %s203_s13 = sand.u32 1, %s843_s20   ;;  %s581_s16 = sshll.u32 %s859_s24, 3 }
  0x18   : > { %s982_s14 = scalar_select %p40_p11, %s843_s20, %s42_s30  }
  0x19   : > { %s580_s15 = sshll.u32 %s203_s13, 5  ;;  %s212_s17 = sadd.s32 %s855_s23, %s581_s16 }
  0x1a   : > { %s207_s26 = scalar_lea.vmem [#allocation2], %s580_s15  ;;  %s582_s18 = sshll.u32 %s212_s17, 7 }
  0x1b   : > { %s215_s28 = sshll.u32 %s207_s26, 4  ;;  %s991_s6 = scalar_lea.hbm %s1133_s0, %s582_s18  ;;  %s986_s28 = int_to_ptr.vmem [resolvable:$true] %s215_s28 }
  0x1c   : > { %p995_p0 = pnand %p660_p13, %p957_p3  ;;  %s999_s10 = scalar_lea.sflag [#allocation3], %s203_s13 }
  0x1d   : > { %s735_s11 = scalar_lea.hbm %s991_s6, 512  ;;  %s740_s7 = scalar_lea.hbm %s1133_s0, 2048 }
  0x1e   : > { %p736_p1 = scmp.ne.s32.totalorder %s991_s6, %s735_s11  ;;  %p737_p2 = pneg %p995_p0 }
  0x1f   : > { %p741_p3 = scmp.lt.u32.totalorder %s991_s6, %s1133_s0  ;;  %p742_p6 = scmp.lt.u32.totalorder %s740_s7, %s735_s11 }
  0x20   : > { %p738_p4 = pnand %p737_p2, %p736_p1  ;;  %p744_p10 = scmp.lt.u32.totalorder %s735_s11, %s991_s6 }
  0x21   : > { %p743_p7 = por %p742_p6, %p741_p3 }
  0x22   : > { %p739_p5 = pneg %p738_p4 }
  0x23   : > { %p745_p11 = por %p744_p10, %p743_p7 }
  0x25   : > { %p746_p13 = pnand %p745_p11, %p739_p5 }
  0x27   : > { %749 = shalt.err (!%p746_p13)
}
  0x28   : > { %s750_s13 = scalar_lea.vmem %s986_s28, 512  ;;  %s865_s17 = smov [#allocation2]  }
  0x29   : > { %p751_p1 = scmp.ne.s32.totalorder %s986_s28, %s750_s13  ;;  %s755_s26 = sshll.u32 %s865_s17, 4  ;;  %s756_s26 = int_to_ptr.vmem [resolvable:$false] %s755_s26 }
  0x2a   : > { %s757_s27 = scalar_lea.vmem %s756_s26, 1024  ;;  %p758_p9 = scmp.lt.s32.totalorder %s986_s28, %s756_s26 }
  0x2b   : > { %p753_p4 = pnand %p751_p1, %p737_p2  ;;  %p759_p3 = scmp.lt.s32.totalorder %s757_s27, %s750_s13 }
  0x2d   : > { %p754_p12 = pneg %p753_p4  ;;  %p760_p6 = por %p759_p3, %p758_p9 }
  0x2f   : > { %p761_p7 = pnand %p760_p6, %p754_p12 }
  0x31   : > { %764 = shalt.err (!%p761_p7)
}
  0x32   : > { %s866_s11 = smov 256   ;;  %s867_s18 = smov 128  }
  0x33   : > { %s868_s29 = smov 8   ;;  %p583_p2 = scmp.ge.s32.totalorder %s863_s25, 1 }
  0x34   : > { %655 = dma.hbm_to_vmem [thread:$0]  (!%p995_p0), %s991_s6, 512, %s986_s28, %s999_s10, %s866_s11, %s867_s18, %s868_s29  }
  0x35   : > { %p223_p5 = scmp.lt.s32.totalorder %s863_s25, 5 }
  0x37   : > { %p224_p10 = pnand %p583_p2, %p223_p5 }
  0x38   : > { %s1030_s7 = sand.u32 (!%p224_p10), 1, %s839_s19  }
  0x39   : > { %227 = sbr.rel (%p224_p10) target bundleno = 530 (0x212), region = 40  ;;  %s584_s15 = sshll.u32 (!%p224_p10), %s1030_s7, 5 }
  0x3a   : > { %s230_s16 = scalar_lea.sflag (!%p224_p10), [#allocation3], %s1030_s7  ;;  %s233_s13 = scalar_lea.vmem (!%p224_p10), [#allocation2], %s584_s15 }
  0x40   : > { %826 = dma.done.wait (%p965_p8), %s230_s16, 512  }
  0x41   : > { %828 = vsyncadd (%p965_p8), %s230_s16, 4294966784  ;;  %v869_v0 = vmov 0   ;;  %vm292_vm0 = vcmask 261120   ;;  %v260_v1 = vld [vmem:[%s233_s13] sm:$0xff]  ;;  %v261_v2 = vld [vmem:[%s233_s13 + $0x8] sm:$0xff]  ;;  %v870_v16 = vmov 0.0|0.0  }
  0x42   : > { %733 = vset.pattern.permute.xlu0 %v869_v0  ;;  %734 = vset.pattern.permute.xlu1 %v869_v0  ;;  %v262_v3 = vld [vmem:[%s233_s13 + $0x10] sm:$0xff]  ;;  %v634_v4 = vpack.c.bf16 %v261_v2, %v260_v1  ;;  %v263_v5 = vld [vmem:[%s233_s13 + $0x18] sm:$0xff]  ;;  %v264_v6 = vld [vmem:[%s1134_s1] sm:$0xff]  ;;  %vm871_vm1 = vmmov 0   ;;  %v872_v17 = vmov 0.0   ;;  %s585_s26 = sshll.u32 %s1030_s7, 3 }
  0x43   : > { %v638_v7 = vpack.c.bf16 %v263_v5, %v262_v3  ;;  %617 = vmatprep.mubr.msk.f32.mxu0 %vm292_vm0, %v264_v6  ;;  %v268_v8 = vld [vmem:[%s1135_s2] sm:$0xff]  ;;  %v270_v9 = vld [vmem:[%s1135_s2 + $0x10] sm:$0xff]  ;;  %v269_v10 = vld [vmem:[%s1135_s2 + $0x8] sm:$0xff]  ;;  %642 = vmatprep.subr.bf16.mxu1 %v870_v16  ;;  %s592_s27 = sshll.u32 %s851_s22, 1  ;;  %s259_s29 = scalar_lea.vmem [#allocation5], %s585_s26 }
  0x44   : > { %635 = vmatprep.subr.bf16.mxu0 %v634_v4  ;;  %274 = vperm.xlu0 %733, %v268_v8   ;;  %v271_v11 = vld [vmem:[%s1135_s2 + $0x18] sm:$0xff]  ;;  %v265_v12 = vld [vmem:[%s1134_s1 + $0x8] sm:$0xff]  ;;  %v395_v13 = vld [vmem:[%s1137_s4] sm:$0xff]  ;;  %s487_s11 = sadd.s32 %s847_s21, %s592_s27  ;;  %s491_s15 = sshll.u32 %s259_s29, 4  ;;  %s1081_s15 = int_to_ptr.vmem [resolvable:$true] %s491_s15 }
  0x45   : > { %637 = vmatpush3.bf16.msra.mxu0 %v634_v4  ;;  %284 = vperm.xlu1 %734, %v270_v9   ;;  %v266_v14 = vld [vmem:[%s1134_s1 + $0x10] sm:$0xff]  ;;  %v267_v15 = vld [vmem:[%s1134_s1 + $0x18] sm:$0xff]  ;;  %v394_v36 = vld [vmem:[%s1136_s3] sm:$0xff]  ;;  %s593_s18 = sshll.u32 %s487_s11, 7  ;;  %s476_s22 = scalar_lea.sflag [#allocation4], %s1030_s7 }
  0x46   : > { %639 = vmatprep.subr.bf16.mxu0 %v638_v7  ;;  %631 = vmatprep.mubr.msk.f32.mxu1 %vm871_vm1, %v872_v17  ;;  %s1079_s28 = scalar_lea.hbm %s1138_s5, %s593_s18  ;;  %s765_s21 = scalar_lea.vmem %s1081_s15, 128 }
  0x47   : > { %p766_p8 = scmp.ne.s32.totalorder %s1081_s15, %s765_s21  ;;  %p1151_p9 = scmp.ne.s32.totalorder %s1148_s9, 0 }
  0x48   : > { %279 = vperm.xlu0 %733, %v269_v10   ;;  %s873_s6 = smov [#allocation5]  }
  0x49   : > { %641 = vmatpush3.bf16.msra.mxu0 %v638_v7  ;;  %289 = vperm.xlu1 %734, %v271_v11   ;;  %p767_p12 = pnand %p766_p8, %p1151_p9  ;;  %s769_s30 = sshll.u32 %s873_s6, 4  ;;  %s770_s30 = int_to_ptr.vmem [resolvable:$false] %s769_s30 }
  0x4a   : > { %s771_s10 = scalar_lea.vmem %s770_s30, 256  ;;  %p772_p11 = scmp.lt.s32.totalorder %s1081_s15, %s770_s30 }
  0x4b   : > { %p768_p0 = pneg %p767_p12  ;;  %p773_p13 = scmp.lt.s32.totalorder %s771_s10, %s765_s21 }
  0x4c   : > { %618 = vmatmul.mubr.msk.f32.vlgmr.msra.gmra.mrb[0].mxu0 %vm292_vm0, %v265_v12  ;;  %398 = vperm.xlu0 %733, %v395_v13  }
  0x4d   : > { %620 = vmatprep.mubr.msk.f32.mxu0 %vm292_vm0, %v266_v14  ;;  %p774_p1 = por %p773_p13, %p772_p11 }
  0x4f   : > { %p775_p4 = pnand %p774_p1, %p768_p0 }
  0x50   : > { %621 = vmatmul.mubr.msk.f32.gmra.mrb[2].mxu0 %vm292_vm0, %v267_v15 }
  0xc3   : > { %v275_v18 = vpop.permute.xlu0 %274 }
  0xc4   : > { %v285_v19 = vpop.permute.xlu1 %284 }
  0xc7   : > { %v280_v20 = vpop.permute.xlu0 %279 }
  0xc8   : > { %v290_v26 = vpop.permute.xlu1 %289 }
  0xcb   : > { %v399_v37 = vpop.permute.xlu0 %398 }
 0x11f   : > { %v619_v21 = vpop.f32.mrb[0].mxu0 }
 0x120   : > { %v377_v22 = vadd.f32 %v619_v21, %v280_v20  ;;  %v371_v23 = vpop.f32.mrb[1].mxu0 }
 0x121   : > { %v372_v24 = vadd.f32 %v371_v23, %v275_v18 }
 0x122   : > { %v391_v25 = vmax.f32 %v377_v22, 0.0 }
 0x123   : > { %v390_v27 = vmax.f32 %v372_v24, 0.0  ;;  %v622_v28 = vpop.f32.mrb[2].mxu0 }
 0x124   : > { %v387_v29 = vadd.f32 %v622_v28, %v290_v26  ;;  %v381_v30 = vpop.f32.mrb[3].mxu0 }
 0x125   : > { %v382_v31 = vadd.f32 %v381_v30, %v285_v19  ;;  %v643_v32 = vpack.c.bf16 %v391_v25, %v390_v27 }
 0x126   : > { %v393_v33 = vmax.f32 %v387_v29, 0.0 }
 0x127   : > { %v392_v34 = vmax.f32 %v382_v31, 0.0  ;;  %644 = vmatpush3.bf16.msra.mxu1 %v643_v32 }
 0x128   : > { %645 = vmatprep.subr.bf16.mxu1 %v870_v16 }
 0x129   : > { %v646_v35 = vpack.c.bf16 %v393_v33, %v392_v34 }
 0x12b   : > { %647 = vmatpush3.bf16.msra.mxu1 %v646_v35 }
 0x12e   : > { %632 = vmatmul.mubr.msk.f32.vlgmr.msra.gmra.mrb[0].mxu1 %vm292_vm0, %v394_v36 }
 0x201   : > { %v470_v38 = vpop.f32.mrb[0].mxu1 }
 0x202   : > { %v471_v39 = vadd.f32 %v470_v38, %v399_v37  ;;  %v633_v40 = vpop.f32.mrb[1].mxu1 }
 0x204   : > { %474 = vst [vmem:[%s259_s29] sm:$0xff] %v471_v39 }
 0x205   : > { %778 = shalt.err (!%p775_p4)
}
 0x206   : > { %s779_s7 = scalar_lea.hbm %s1079_s28, 128  ;;  %s783_s26 = scalar_lea.hbm %s1138_s5, 512 }
 0x207   : > { %p780_p3 = scmp.ne.s32.totalorder %s1079_s28, %s779_s7  ;;  %p784_p2 = scmp.lt.u32.totalorder %s1079_s28, %s1138_s5 }
 0x208   : > { %p785_p5 = scmp.lt.u32.totalorder %s783_s26, %s779_s7  ;;  %p787_p8 = scmp.lt.u32.totalorder %s779_s7, %s1079_s28 }
 0x209   : > { %p781_p6 = pnand %p780_p3, %p1151_p9 }
 0x20a   : > { %p786_p10 = por %p785_p5, %p784_p2 }
 0x20b   : > { %p782_p7 = pneg %p781_p6 }
 0x20c   : > { %p788_p12 = por %p787_p8, %p786_p10 }
 0x20e   : > { %p789_p0 = pnand %p788_p12, %p782_p7 }
 0x210   : > { %792 = shalt.err (!%p789_p0)
}
 0x211   : > { %650 = dma.vmem_to_hbm [thread:$0]  (%p1151_p9), %s1081_s15, 128, %s1079_s28, %s476_s22  }
 0x212 PF: > { %s1152_s18 = sld [smem:[#allocation8_spill]]  ;;  %p661_p11 = scmp.ge.s32.totalorder %s863_s25, 2 }
 0x213   : > { %p1153_p13 = scmp.ne.s32.totalorder %s1149_s12, 0 }
 0x215   : > { %p657_p1 = pnand %p661_p11, %p1153_p13 }
 0x218   : > { %s503_s29 = sand.u32 1, %s1152_s18  }
 0x219   : > { %s504_s16 = scalar_lea.sflag [#allocation4], %s503_s29 }
 0x21a   : > { %830 = dma.done.wait (!%p657_p1), %s504_s16, 128  }
 0x21b   : > { %832 = vsyncadd (!%p657_p1), %s504_s16, 4294967168  ;;  %s21_s25 = sadd.s32 1, %s863_s25   ;;  %s1154_s9 = sld [smem:[#allocation9_spill]] }
 0x21c   : > { %p18_p4 = scmp.ge.s32.totalorder %s21_s25, 6   ;;  %s1155_s15 = sld [smem:[#allocation10_spill]] }
 0x21d   : > { %s1156_s18 = smov %s839_s19  ;;  %s1157_s19 = smov %s843_s20 }
 0x21e   : > { %s1158_s20 = smov %s982_s14  ;;  %s1159_s21 = smov %s855_s23 }
 0x21f   : > { %s1160_s22 = smov %s859_s24  ;;  %20 = sbr.rel (!%p18_p4) target bundleno = 7 (0x7), region = 85 }
 0x221   : > { %s1161_s23 = smov %s1154_s9 }
 0x222   : > { %s1162_s24 = smov %s1155_s15 }
 0x226   :  { %509 = vsyncpa [#allocation3], 1 }
 0x227   :  { %511 = vsyncpa [#allocation3 + $0x1], 1 }
 0x228   :  { %512 = vsyncpa [#allocation4], 1 }
 0x229   :  { %514 = vsyncpa [#allocation4 + $0x1], 1 }

</bundles_post_ra>
